<compile_context>
chip_gen: v6e
topology: v6e:2x2x1
jax: 0.10.0
libtpu: 0.0.40
codegen_flags: <defaults>
</compile_context>

<pallas_src>
import jax
import jax.numpy as jnp
import numpy as np
from jax.experimental import pallas as pl
from jax.experimental.pallas import tpu as pltpu

_LANE = 128  # one vreg lane width; each gate block is padded to this


def _gru_recurrence_kernel(gx_ref, wh_ref, bhn_ref, h_out_ref):
    """Serial GRU recurrence over a fully VMEM-resident, gate-aligned layout.

    gx_ref : (S, B, 3*HP) f32 -- x @ Wx_pad + (bx + [bh_r, bh_z, 0]) ; gate g
             lives in lanes [g*HP, g*HP + H), remaining lanes are zero.
    wh_ref : (HP, 3*HP) f32   -- Wh^T padded with zero rows/lanes.
    bhn_ref: (1, HP) f32      -- bh_n padded with zero lanes.
    h_out_ref: (B, HP) f32    -- final hidden state (live lanes 0..H-1).
    """
    S, B, _ = gx_ref.shape
    HP = wh_ref.shape[0]

    # Loop-invariant operands: load once, keep resident. bf16 operands for the
    # MXU (f32 accumulation); all gate math stays f32.
    wh_bf16 = wh_ref[...].astype(jnp.bfloat16)          # (HP, 3*HP)
    bh_n = bhn_ref[...]                                  # (1, HP) f32

    def step(t, h):
        gx = gx_ref[t]                                   # (B, 3*HP) leading-axis load
        gh = jnp.dot(h.astype(jnp.bfloat16), wh_bf16,
                     preferred_element_type=jnp.float32)  # (B, 3*HP) f32 acc
        # Gate slices are 128-lane aligned (offsets 0 / HP / 2*HP).
        r = jax.nn.sigmoid(gx[:, :HP] + gh[:, :HP])            # bh_r folded into gx
        z = jax.nn.sigmoid(gx[:, HP:2 * HP] + gh[:, HP:2 * HP])  # bh_z folded into gx
        n = jnp.tanh(gx[:, 2 * HP:] + r * (gh[:, 2 * HP:] + bh_n))
        return n + z * (h - n)

    h0 = jnp.zeros((B, HP), jnp.float32)
    h_out_ref[...] = jax.lax.fori_loop(0, S, step, h0, unroll=True)


def _pad_gate_cols(m, H, HP):
    """(..., 3H) -> (..., 3*HP): place gate g at lanes [g*HP, g*HP+H), zero elsewhere."""
    r, z, n = jnp.split(m, 3, axis=-1)
    pad = [(0, 0)] * (m.ndim - 1) + [(0, HP - H)]
    return jnp.concatenate(
        [jnp.pad(r, pad), jnp.pad(z, pad), jnp.pad(n, pad)], axis=-1)


@jax.jit
def gru_model_forward(x, params):
    """x: (batch, seq, input_dim) f32 -> (batch, output_dim) f32."""
    wx_t, wh_t, bx, bh, wfc_t, bfc = params           # wx_t: (D,3H)  wh_t: (H,3H)
    B, S, D = x.shape
    H = wh_t.shape[0]
    HP = _LANE

    bx_r, bx_z, bx_n = jnp.split(bx, 3)
    bh_r, bh_z, bh_n = jnp.split(bh, 3)

    # Gate-aligned (lane-padded) weights / biases. bh_r, bh_z folded into the
    # time-independent bias; bh_n stays in-kernel inside r*(h@Wh_n + bh_n).
    wx_pad = _pad_gate_cols(wx_t, H, HP)                                   # (D, 3*HP)
    bias_in = _pad_gate_cols(
        jnp.concatenate([bx_r + bh_r, bx_z + bh_z, bx_n])[None, :], H, HP)  # (1, 3*HP)
    wh_pad = jnp.pad(_pad_gate_cols(wh_t, H, HP), ((0, HP - H), (0, 0)))   # (HP, 3*HP)
    bh_n_pad = jnp.pad(bh_n[None, :], ((0, 0), (0, HP - H)))               # (1, HP)

    # (1) Time-independent input projection for ALL timesteps, emitted directly
    #     in (S, B, 3*HP) layout so the kernel indexes the leading axis.
    gx_all = jnp.einsum('bsd,dg->sbg', x, wx_pad) + bias_in[None]

    # (2) Single-shot Pallas kernel: whole recurrence over VMEM-resident
    #     operands, no grid / no pipeline machinery.
    h_last = pl.pallas_call(
        _gru_recurrence_kernel,
        out_shape=jax.ShapeDtypeStruct((B, HP), jnp.float32),
        in_specs=[
            pl.BlockSpec(memory_space=pltpu.MemorySpace.VMEM),  # gx_all
            pl.BlockSpec(memory_space=pltpu.MemorySpace.VMEM),  # Wh_pad
            pl.BlockSpec(memory_space=pltpu.MemorySpace.VMEM),  # bh_n_pad
        ],
        out_specs=pl.BlockSpec(memory_space=pltpu.MemorySpace.VMEM),
    )(gx_all, wh_pad, bh_n_pad)

    # (3) Tiny final FC (O=8) on the last hidden state, hoisted out of the kernel.
    return h_last[:, :H] @ wfc_t + bfc


def gru_model_reference(x, params):
    """Pure-JAX f32 reference matching the PyTorch module exactly."""
    wx_t, wh_t, bx, bh, wfc_t, bfc = params
    B, S, D = x.shape
    H = wh_t.shape[0]
    h = jnp.zeros((B, H), jnp.float32)
    for t in range(S):
        gx = x[:, t, :] @ wx_t + bx
        gh = h @ wh_t + bh
        i_r, i_z, i_n = jnp.split(gx, 3, axis=1)
        h_r, h_z, h_n = jnp.split(gh, 3, axis=1)
        r = jax.nn.sigmoid(i_r + h_r)
        z = jax.nn.sigmoid(i_z + h_z)
        n = jnp.tanh(i_n + r * h_n)
        h = n + z * (h - n)
    return h @ wfc_t + bfc


def init_params(key, input_dim, hidden_dim, output_dim):
    """Deterministic uniform(-1/sqrt(H), 1/sqrt(H)) init, PyTorch-style."""
    ks = jax.random.split(key, 6)
    k = 1.0 / np.sqrt(hidden_dim)
    wx = jax.random.uniform(ks[0], (3 * hidden_dim, input_dim), jnp.float32, -k, k)
    wh = jax.random.uniform(ks[1], (3 * hidden_dim, hidden_dim), jnp.float32, -k, k)
    bx = jax.random.uniform(ks[2], (3 * hidden_dim,), jnp.float32, -k, k)
    bh = jax.random.uniform(ks[3], (3 * hidden_dim,), jnp.float32, -k, k)
    wfc = jax.random.uniform(ks[4], (output_dim, hidden_dim), jnp.float32, -k, k)
    bfc = jax.random.uniform(ks[5], (output_dim,), jnp.float32, -k, k)
    # pass transposed weights so matmuls are plain row-major (in, out)
    return (wx.T, wh.T, bx, bh, wfc.T, bfc)


if __name__ == "__main__":
    batch, seq, input_dim, hidden_dim, output_dim = 8, 8, 16, 32, 8

    key = jax.random.PRNGKey(0)
    kx, kp = jax.random.split(key)
    x = jax.random.normal(kx, (batch, seq, input_dim), jnp.float32)
    params = init_params(kp, input_dim, hidden_dim, output_dim)

    out = gru_model_forward(x, params)
    out = jax.block_until_ready(out)

    ref = gru_model_reference(x, params)
    # bf16 MXU operands (per perf review) slightly loosen the f32 match; at
    # K=32 contraction depth the 2e-3 tolerance still holds comfortably.
    np.testing.assert_allclose(np.asarray(out), np.asarray(ref),
                               rtol=2e-3, atol=2e-3)

    print("KERNEL_OK")
</pallas_src>

<mosaic_0001>
module attributes {stable_mosaic.version = 11 : i64} {
  func.func @_gru_recurrence_kernel(%arg0: memref<8x8x384xf32, #tpu.memory_space<vmem>>, %arg1: memref<128x384xf32, #tpu.memory_space<vmem>>, %arg2: memref<1x128xf32, #tpu.memory_space<vmem>>, %arg3: memref<8x128xf32, #tpu.memory_space<vmem>>) attributes {dimension_semantics = [], scalar_prefetch = 0 : i64, scratch_operands = 0 : i64, tpu.core_type = #tpu.core_type<tc>} {
    %c0 = arith.constant 0 : index
    %c0_0 = arith.constant 0 : index
    %0 = vector.load %arg1[%c0, %c0_0] : memref<128x384xf32, #tpu.memory_space<vmem>>, vector<128x384xf32>
    %1 = arith.truncf %0 : vector<128x384xf32> to vector<128x384xbf16>
    %c0_1 = arith.constant 0 : index
    %c0_2 = arith.constant 0 : index
    %2 = vector.load %arg2[%c0_1, %c0_2] : memref<1x128xf32, #tpu.memory_space<vmem>>, vector<1x128xf32>
    %cst = arith.constant 0.000000e+00 : f32
    %3 = vector.broadcast %cst : f32 to vector<8x128xf32>
    %c0_i32 = arith.constant 0 : i32
    %4 = arith.index_cast %c0_i32 : i32 to index
    %c0_3 = arith.constant 0 : index
    %c0_4 = arith.constant 0 : index
    %5 = vector.load %arg0[%4, %c0_3, %c0_4] : memref<8x8x384xf32, #tpu.memory_space<vmem>>, vector<1x8x384xf32>
    %6 = vector.shape_cast %5 : vector<1x8x384xf32> to vector<8x384xf32>
    %7 = arith.truncf %3 : vector<8x128xf32> to vector<8x128xbf16>
    %cst_5 = arith.constant dense<0.000000e+00> : vector<8x384xf32>
    %8 = tpu.matmul %7, %1, %cst_5 {dimension_numbers = #tpu.dot_dimension_numbers<[1], [0], [0], [1], [0, 0, 1, 1], [], []>} : vector<8x128xbf16>, vector<128x384xbf16>, vector<8x384xf32> -> vector<8x384xf32>
    %9 = vector.extract_strided_slice %6 {offsets = [0, 0], sizes = [8, 128], strides = [1, 1]} : vector<8x384xf32> to vector<8x128xf32>
    %10 = vector.extract_strided_slice %8 {offsets = [0, 0], sizes = [8, 128], strides = [1, 1]} : vector<8x384xf32> to vector<8x128xf32>
    %11 = arith.addf %9, %10 : vector<8x128xf32>
    %12 = arith.negf %11 : vector<8x128xf32>
    %13 = math.exp %12 : vector<8x128xf32>
    %cst_6 = arith.constant 1.000000e+00 : f32
    %14 = vector.broadcast %cst_6 : f32 to vector<8x128xf32>
    %15 = arith.addf %14, %13 : vector<8x128xf32>
    %16 = arith.divf %14, %15 : vector<8x128xf32>
    %17 = vector.extract_strided_slice %6 {offsets = [0, 128], sizes = [8, 128], strides = [1, 1]} : vector<8x384xf32> to vector<8x128xf32>
    %18 = vector.extract_strided_slice %8 {offsets = [0, 128], sizes = [8, 128], strides = [1, 1]} : vector<8x384xf32> to vector<8x128xf32>
    %19 = arith.addf %17, %18 : vector<8x128xf32>
    %20 = arith.negf %19 : vector<8x128xf32>
    %21 = math.exp %20 : vector<8x128xf32>
    %cst_7 = arith.constant 1.000000e+00 : f32
    %22 = vector.broadcast %cst_7 : f32 to vector<8x128xf32>
    %23 = arith.addf %22, %21 : vector<8x128xf32>
    %24 = arith.divf %22, %23 : vector<8x128xf32>
    %25 = vector.extract_strided_slice %6 {offsets = [0, 256], sizes = [8, 128], strides = [1, 1]} : vector<8x384xf32> to vector<8x128xf32>
    %26 = vector.extract_strided_slice %8 {offsets = [0, 256], sizes = [8, 128], strides = [1, 1]} : vector<8x384xf32> to vector<8x128xf32>
    %27 = vector.broadcast %2 : vector<1x128xf32> to vector<8x128xf32>
    %28 = arith.addf %26, %27 : vector<8x128xf32>
    %29 = arith.mulf %16, %28 : vector<8x128xf32>
    %30 = arith.addf %25, %29 : vector<8x128xf32>
    %31 = math.tanh %30 : vector<8x128xf32>
    %32 = arith.subf %3, %31 : vector<8x128xf32>
    %33 = arith.mulf %24, %32 : vector<8x128xf32>
    %34 = arith.addf %31, %33 : vector<8x128xf32>
    %c1_i32 = arith.constant 1 : i32
    %35 = arith.index_cast %c1_i32 : i32 to index
    %c0_8 = arith.constant 0 : index
    %c0_9 = arith.constant 0 : index
    %36 = vector.load %arg0[%35, %c0_8, %c0_9] : memref<8x8x384xf32, #tpu.memory_space<vmem>>, vector<1x8x384xf32>
    %37 = vector.shape_cast %36 : vector<1x8x384xf32> to vector<8x384xf32>
    %38 = arith.truncf %34 : vector<8x128xf32> to vector<8x128xbf16>
    %cst_10 = arith.constant dense<0.000000e+00> : vector<8x384xf32>
    %39 = tpu.matmul %38, %1, %cst_10 {dimension_numbers = #tpu.dot_dimension_numbers<[1], [0], [0], [1], [0, 0, 1, 1], [], []>} : vector<8x128xbf16>, vector<128x384xbf16>, vector<8x384xf32> -> vector<8x384xf32>
    %40 = vector.extract_strided_slice %37 {offsets = [0, 0], sizes = [8, 128], strides = [1, 1]} : vector<8x384xf32> to vector<8x128xf32>
    %41 = vector.extract_strided_slice %39 {offsets = [0, 0], sizes = [8, 128], strides = [1, 1]} : vector<8x384xf32> to vector<8x128xf32>
    %42 = arith.addf %40, %41 : vector<8x128xf32>
    %43 = arith.negf %42 : vector<8x128xf32>
    %44 = math.exp %43 : vector<8x128xf32>
    %cst_11 = arith.constant 1.000000e+00 : f32
    %45 = vector.broadcast %cst_11 : f32 to vector<8x128xf32>
    %46 = arith.addf %45, %44 : vector<8x128xf32>
    %47 = arith.divf %45, %46 : vector<8x128xf32>
    %48 = vector.extract_strided_slice %37 {offsets = [0, 128], sizes = [8, 128], strides = [1, 1]} : vector<8x384xf32> to vector<8x128xf32>
    %49 = vector.extract_strided_slice %39 {offsets = [0, 128], sizes = [8, 128], strides = [1, 1]} : vector<8x384xf32> to vector<8x128xf32>
    %50 = arith.addf %48, %49 : vector<8x128xf32>
    %51 = arith.negf %50 : vector<8x128xf32>
    %52 = math.exp %51 : vector<8x128xf32>
    %cst_12 = arith.constant 1.000000e+00 : f32
    %53 = vector.broadcast %cst_12 : f32 to vector<8x128xf32>
    %54 = arith.addf %53, %52 : vector<8x128xf32>
    %55 = arith.divf %53, %54 : vector<8x128xf32>
    %56 = vector.extract_strided_slice %37 {offsets = [0, 256], sizes = [8, 128], strides = [1, 1]} : vector<8x384xf32> to vector<8x128xf32>
    %57 = vector.extract_strided_slice %39 {offsets = [0, 256], sizes = [8, 128], strides = [1, 1]} : vector<8x384xf32> to vector<8x128xf32>
    %58 = vector.broadcast %2 : vector<1x128xf32> to vector<8x128xf32>
    %59 = arith.addf %57, %58 : vector<8x128xf32>
    %60 = arith.mulf %47, %59 : vector<8x128xf32>
    %61 = arith.addf %56, %60 : vector<8x128xf32>
    %62 = math.tanh %61 : vector<8x128xf32>
    %63 = arith.subf %34, %62 : vector<8x128xf32>
    %64 = arith.mulf %55, %63 : vector<8x128xf32>
    %65 = arith.addf %62, %64 : vector<8x128xf32>
    %c2_i32 = arith.constant 2 : i32
    %66 = arith.index_cast %c2_i32 : i32 to index
    %c0_13 = arith.constant 0 : index
    %c0_14 = arith.constant 0 : index
    %67 = vector.load %arg0[%66, %c0_13, %c0_14] : memref<8x8x384xf32, #tpu.memory_space<vmem>>, vector<1x8x384xf32>
    %68 = vector.shape_cast %67 : vector<1x8x384xf32> to vector<8x384xf32>
    %69 = arith.truncf %65 : vector<8x128xf32> to vector<8x128xbf16>
    %cst_15 = arith.constant dense<0.000000e+00> : vector<8x384xf32>
    %70 = tpu.matmul %69, %1, %cst_15 {dimension_numbers = #tpu.dot_dimension_numbers<[1], [0], [0], [1], [0, 0, 1, 1], [], []>} : vector<8x128xbf16>, vector<128x384xbf16>, vector<8x384xf32> -> vector<8x384xf32>
    %71 = vector.extract_strided_slice %68 {offsets = [0, 0], sizes = [8, 128], strides = [1, 1]} : vector<8x384xf32> to vector<8x128xf32>
    %72 = vector.extract_strided_slice %70 {offsets = [0, 0], sizes = [8, 128], strides = [1, 1]} : vector<8x384xf32> to vector<8x128xf32>
    %73 = arith.addf %71, %72 : vector<8x128xf32>
    %74 = arith.negf %73 : vector<8x128xf32>
    %75 = math.exp %74 : vector<8x128xf32>
    %cst_16 = arith.constant 1.000000e+00 : f32
    %76 = vector.broadcast %cst_16 : f32 to vector<8x128xf32>
    %77 = arith.addf %76, %75 : vector<8x128xf32>
    %78 = arith.divf %76, %77 : vector<8x128xf32>
    %79 = vector.extract_strided_slice %68 {offsets = [0, 128], sizes = [8, 128], strides = [1, 1]} : vector<8x384xf32> to vector<8x128xf32>
    %80 = vector.extract_strided_slice %70 {offsets = [0, 128], sizes = [8, 128], strides = [1, 1]} : vector<8x384xf32> to vector<8x128xf32>
    %81 = arith.addf %79, %80 : vector<8x128xf32>
    %82 = arith.negf %81 : vector<8x128xf32>
    %83 = math.exp %82 : vector<8x128xf32>
    %cst_17 = arith.constant 1.000000e+00 : f32
    %84 = vector.broadcast %cst_17 : f32 to vector<8x128xf32>
    %85 = arith.addf %84, %83 : vector<8x128xf32>
    %86 = arith.divf %84, %85 : vector<8x128xf32>
    %87 = vector.extract_strided_slice %68 {offsets = [0, 256], sizes = [8, 128], strides = [1, 1]} : vector<8x384xf32> to vector<8x128xf32>
    %88 = vector.extract_strided_slice %70 {offsets = [0, 256], sizes = [8, 128], strides = [1, 1]} : vector<8x384xf32> to vector<8x128xf32>
    %89 = vector.broadcast %2 : vector<1x128xf32> to vector<8x128xf32>
    %90 = arith.addf %88, %89 : vector<8x128xf32>
    %91 = arith.mulf %78, %90 : vector<8x128xf32>
    %92 = arith.addf %87, %91 : vector<8x128xf32>
    %93 = math.tanh %92 : vector<8x128xf32>
    %94 = arith.subf %65, %93 : vector<8x128xf32>
    %95 = arith.mulf %86, %94 : vector<8x128xf32>
    %96 = arith.addf %93, %95 : vector<8x128xf32>
    %c3_i32 = arith.constant 3 : i32
    %97 = arith.index_cast %c3_i32 : i32 to index
    %c0_18 = arith.constant 0 : index
    %c0_19 = arith.constant 0 : index
    %98 = vector.load %arg0[%97, %c0_18, %c0_19] : memref<8x8x384xf32, #tpu.memory_space<vmem>>, vector<1x8x384xf32>
    %99 = vector.shape_cast %98 : vector<1x8x384xf32> to vector<8x384xf32>
    %100 = arith.truncf %96 : vector<8x128xf32> to vector<8x128xbf16>
    %cst_20 = arith.constant dense<0.000000e+00> : vector<8x384xf32>
    %101 = tpu.matmul %100, %1, %cst_20 {dimension_numbers = #tpu.dot_dimension_numbers<[1], [0], [0], [1], [0, 0, 1, 1], [], []>} : vector<8x128xbf16>, vector<128x384xbf16>, vector<8x384xf32> -> vector<8x384xf32>
    %102 = vector.extract_strided_slice %99 {offsets = [0, 0], sizes = [8, 128], strides = [1, 1]} : vector<8x384xf32> to vector<8x128xf32>
    %103 = vector.extract_strided_slice %101 {offsets = [0, 0], sizes = [8, 128], strides = [1, 1]} : vector<8x384xf32> to vector<8x128xf32>
    %104 = arith.addf %102, %103 : vector<8x128xf32>
    %105 = arith.negf %104 : vector<8x128xf32>
    %106 = math.exp %105 : vector<8x128xf32>
    %cst_21 = arith.constant 1.000000e+00 : f32
    %107 = vector.broadcast %cst_21 : f32 to vector<8x128xf32>
    %108 = arith.addf %107, %106 : vector<8x128xf32>
    %109 = arith.divf %107, %108 : vector<8x128xf32>
    %110 = vector.extract_strided_slice %99 {offsets = [0, 128], sizes = [8, 128], strides = [1, 1]} : vector<8x384xf32> to vector<8x128xf32>
    %111 = vector.extract_strided_slice %101 {offsets = [0, 128], sizes = [8, 128], strides = [1, 1]} : vector<8x384xf32> to vector<8x128xf32>
    %112 = arith.addf %110, %111 : vector<8x128xf32>
    %113 = arith.negf %112 : vector<8x128xf32>
    %114 = math.exp %113 : vector<8x128xf32>
    %cst_22 = arith.constant 1.000000e+00 : f32
    %115 = vector.broadcast %cst_22 : f32 to vector<8x128xf32>
    %116 = arith.addf %115, %114 : vector<8x128xf32>
    %117 = arith.divf %115, %116 : vector<8x128xf32>
    %118 = vector.extract_strided_slice %99 {offsets = [0, 256], sizes = [8, 128], strides = [1, 1]} : vector<8x384xf32> to vector<8x128xf32>
    %119 = vector.extract_strided_slice %101 {offsets = [0, 256], sizes = [8, 128], strides = [1, 1]} : vector<8x384xf32> to vector<8x128xf32>
    %120 = vector.broadcast %2 : vector<1x128xf32> to vector<8x128xf32>
    %121 = arith.addf %119, %120 : vector<8x128xf32>
    %122 = arith.mulf %109, %121 : vector<8x128xf32>
    %123 = arith.addf %118, %122 : vector<8x128xf32>
    %124 = math.tanh %123 : vector<8x128xf32>
    %125 = arith.subf %96, %124 : vector<8x128xf32>
    %126 = arith.mulf %117, %125 : vector<8x128xf32>
    %127 = arith.addf %124, %126 : vector<8x128xf32>
    %c4_i32 = arith.constant 4 : i32
    %128 = arith.index_cast %c4_i32 : i32 to index
    %c0_23 = arith.constant 0 : index
    %c0_24 = arith.constant 0 : index
    %129 = vector.load %arg0[%128, %c0_23, %c0_24] : memref<8x8x384xf32, #tpu.memory_space<vmem>>, vector<1x8x384xf32>
    %130 = vector.shape_cast %129 : vector<1x8x384xf32> to vector<8x384xf32>
    %131 = arith.truncf %127 : vector<8x128xf32> to vector<8x128xbf16>
    %cst_25 = arith.constant dense<0.000000e+00> : vector<8x384xf32>
    %132 = tpu.matmul %131, %1, %cst_25 {dimension_numbers = #tpu.dot_dimension_numbers<[1], [0], [0], [1], [0, 0, 1, 1], [], []>} : vector<8x128xbf16>, vector<128x384xbf16>, vector<8x384xf32> -> vector<8x384xf32>
    %133 = vector.extract_strided_slice %130 {offsets = [0, 0], sizes = [8, 128], strides = [1, 1]} : vector<8x384xf32> to vector<8x128xf32>
    %134 = vector.extract_strided_slice %132 {offsets = [0, 0], sizes = [8, 128], strides = [1, 1]} : vector<8x384xf32> to vector<8x128xf32>
    %135 = arith.addf %133, %134 : vector<8x128xf32>
    %136 = arith.negf %135 : vector<8x128xf32>
    %137 = math.exp %136 : vector<8x128xf32>
    %cst_26 = arith.constant 1.000000e+00 : f32
    %138 = vector.broadcast %cst_26 : f32 to vector<8x128xf32>
    %139 = arith.addf %138, %137 : vector<8x128xf32>
    %140 = arith.divf %138, %139 : vector<8x128xf32>
    %141 = vector.extract_strided_slice %130 {offsets = [0, 128], sizes = [8, 128], strides = [1, 1]} : vector<8x384xf32> to vector<8x128xf32>
    %142 = vector.extract_strided_slice %132 {offsets = [0, 128], sizes = [8, 128], strides = [1, 1]} : vector<8x384xf32> to vector<8x128xf32>
    %143 = arith.addf %141, %142 : vector<8x128xf32>
    %144 = arith.negf %143 : vector<8x128xf32>
    %145 = math.exp %144 : vector<8x128xf32>
    %cst_27 = arith.constant 1.000000e+00 : f32
    %146 = vector.broadcast %cst_27 : f32 to vector<8x128xf32>
    %147 = arith.addf %146, %145 : vector<8x128xf32>
    %148 = arith.divf %146, %147 : vector<8x128xf32>
    %149 = vector.extract_strided_slice %130 {offsets = [0, 256], sizes = [8, 128], strides = [1, 1]} : vector<8x384xf32> to vector<8x128xf32>
    %150 = vector.extract_strided_slice %132 {offsets = [0, 256], sizes = [8, 128], strides = [1, 1]} : vector<8x384xf32> to vector<8x128xf32>
    %151 = vector.broadcast %2 : vector<1x128xf32> to vector<8x128xf32>
    %152 = arith.addf %150, %151 : vector<8x128xf32>
    %153 = arith.mulf %140, %152 : vector<8x128xf32>
    %154 = arith.addf %149, %153 : vector<8x128xf32>
    %155 = math.tanh %154 : vector<8x128xf32>
    %156 = arith.subf %127, %155 : vector<8x128xf32>
    %157 = arith.mulf %148, %156 : vector<8x128xf32>
    %158 = arith.addf %155, %157 : vector<8x128xf32>
    %c5_i32 = arith.constant 5 : i32
    %159 = arith.index_cast %c5_i32 : i32 to index
    %c0_28 = arith.constant 0 : index
    %c0_29 = arith.constant 0 : index
    %160 = vector.load %arg0[%159, %c0_28, %c0_29] : memref<8x8x384xf32, #tpu.memory_space<vmem>>, vector<1x8x384xf32>
    %161 = vector.shape_cast %160 : vector<1x8x384xf32> to vector<8x384xf32>
    %162 = arith.truncf %158 : vector<8x128xf32> to vector<8x128xbf16>
    %cst_30 = arith.constant dense<0.000000e+00> : vector<8x384xf32>
    %163 = tpu.matmul %162, %1, %cst_30 {dimension_numbers = #tpu.dot_dimension_numbers<[1], [0], [0], [1], [0, 0, 1, 1], [], []>} : vector<8x128xbf16>, vector<128x384xbf16>, vector<8x384xf32> -> vector<8x384xf32>
    %164 = vector.extract_strided_slice %161 {offsets = [0, 0], sizes = [8, 128], strides = [1, 1]} : vector<8x384xf32> to vector<8x128xf32>
    %165 = vector.extract_strided_slice %163 {offsets = [0, 0], sizes = [8, 128], strides = [1, 1]} : vector<8x384xf32> to vector<8x128xf32>
    %166 = arith.addf %164, %165 : vector<8x128xf32>
    %167 = arith.negf %166 : vector<8x128xf32>
    %168 = math.exp %167 : vector<8x128xf32>
    %cst_31 = arith.constant 1.000000e+00 : f32
    %169 = vector.broadcast %cst_31 : f32 to vector<8x128xf32>
    %170 = arith.addf %169, %168 : vector<8x128xf32>
    %171 = arith.divf %169, %170 : vector<8x128xf32>
    %172 = vector.extract_strided_slice %161 {offsets = [0, 128], sizes = [8, 128], strides = [1, 1]} : vector<8x384xf32> to vector<8x128xf32>
    %173 = vector.extract_strided_slice %163 {offsets = [0, 128], sizes = [8, 128], strides = [1, 1]} : vector<8x384xf32> to vector<8x128xf32>
    %174 = arith.addf %172, %173 : vector<8x128xf32>
    %175 = arith.negf %174 : vector<8x128xf32>
    %176 = math.exp %175 : vector<8x128xf32>
    %cst_32 = arith.constant 1.000000e+00 : f32
    %177 = vector.broadcast %cst_32 : f32 to vector<8x128xf32>
    %178 = arith.addf %177, %176 : vector<8x128xf32>
    %179 = arith.divf %177, %178 : vector<8x128xf32>
    %180 = vector.extract_strided_slice %161 {offsets = [0, 256], sizes = [8, 128], strides = [1, 1]} : vector<8x384xf32> to vector<8x128xf32>
    %181 = vector.extract_strided_slice %163 {offsets = [0, 256], sizes = [8, 128], strides = [1, 1]} : vector<8x384xf32> to vector<8x128xf32>
    %182 = vector.broadcast %2 : vector<1x128xf32> to vector<8x128xf32>
    %183 = arith.addf %181, %182 : vector<8x128xf32>
    %184 = arith.mulf %171, %183 : vector<8x128xf32>
    %185 = arith.addf %180, %184 : vector<8x128xf32>
    %186 = math.tanh %185 : vector<8x128xf32>
    %187 = arith.subf %158, %186 : vector<8x128xf32>
    %188 = arith.mulf %179, %187 : vector<8x128xf32>
    %189 = arith.addf %186, %188 : vector<8x128xf32>
    %c6_i32 = arith.constant 6 : i32
    %190 = arith.index_cast %c6_i32 : i32 to index
    %c0_33 = arith.constant 0 : index
    %c0_34 = arith.constant 0 : index
    %191 = vector.load %arg0[%190, %c0_33, %c0_34] : memref<8x8x384xf32, #tpu.memory_space<vmem>>, vector<1x8x384xf32>
    %192 = vector.shape_cast %191 : vector<1x8x384xf32> to vector<8x384xf32>
    %193 = arith.truncf %189 : vector<8x128xf32> to vector<8x128xbf16>
    %cst_35 = arith.constant dense<0.000000e+00> : vector<8x384xf32>
    %194 = tpu.matmul %193, %1, %cst_35 {dimension_numbers = #tpu.dot_dimension_numbers<[1], [0], [0], [1], [0, 0, 1, 1], [], []>} : vector<8x128xbf16>, vector<128x384xbf16>, vector<8x384xf32> -> vector<8x384xf32>
    %195 = vector.extract_strided_slice %192 {offsets = [0, 0], sizes = [8, 128], strides = [1, 1]} : vector<8x384xf32> to vector<8x128xf32>
    %196 = vector.extract_strided_slice %194 {offsets = [0, 0], sizes = [8, 128], strides = [1, 1]} : vector<8x384xf32> to vector<8x128xf32>
    %197 = arith.addf %195, %196 : vector<8x128xf32>
    %198 = arith.negf %197 : vector<8x128xf32>
    %199 = math.exp %198 : vector<8x128xf32>
    %cst_36 = arith.constant 1.000000e+00 : f32
    %200 = vector.broadcast %cst_36 : f32 to vector<8x128xf32>
    %201 = arith.addf %200, %199 : vector<8x128xf32>
    %202 = arith.divf %200, %201 : vector<8x128xf32>
    %203 = vector.extract_strided_slice %192 {offsets = [0, 128], sizes = [8, 128], strides = [1, 1]} : vector<8x384xf32> to vector<8x128xf32>
    %204 = vector.extract_strided_slice %194 {offsets = [0, 128], sizes = [8, 128], strides = [1, 1]} : vector<8x384xf32> to vector<8x128xf32>
    %205 = arith.addf %203, %204 : vector<8x128xf32>
    %206 = arith.negf %205 : vector<8x128xf32>
    %207 = math.exp %206 : vector<8x128xf32>
    %cst_37 = arith.constant 1.000000e+00 : f32
    %208 = vector.broadcast %cst_37 : f32 to vector<8x128xf32>
    %209 = arith.addf %208, %207 : vector<8x128xf32>
    %210 = arith.divf %208, %209 : vector<8x128xf32>
    %211 = vector.extract_strided_slice %192 {offsets = [0, 256], sizes = [8, 128], strides = [1, 1]} : vector<8x384xf32> to vector<8x128xf32>
    %212 = vector.extract_strided_slice %194 {offsets = [0, 256], sizes = [8, 128], strides = [1, 1]} : vector<8x384xf32> to vector<8x128xf32>
    %213 = vector.broadcast %2 : vector<1x128xf32> to vector<8x128xf32>
    %214 = arith.addf %212, %213 : vector<8x128xf32>
    %215 = arith.mulf %202, %214 : vector<8x128xf32>
    %216 = arith.addf %211, %215 : vector<8x128xf32>
    %217 = math.tanh %216 : vector<8x128xf32>
    %218 = arith.subf %189, %217 : vector<8x128xf32>
    %219 = arith.mulf %210, %218 : vector<8x128xf32>
    %220 = arith.addf %217, %219 : vector<8x128xf32>
    %c7_i32 = arith.constant 7 : i32
    %221 = arith.index_cast %c7_i32 : i32 to index
    %c0_38 = arith.constant 0 : index
    %c0_39 = arith.constant 0 : index
    %222 = vector.load %arg0[%221, %c0_38, %c0_39] : memref<8x8x384xf32, #tpu.memory_space<vmem>>, vector<1x8x384xf32>
    %223 = vector.shape_cast %222 : vector<1x8x384xf32> to vector<8x384xf32>
    %224 = arith.truncf %220 : vector<8x128xf32> to vector<8x128xbf16>
    %cst_40 = arith.constant dense<0.000000e+00> : vector<8x384xf32>
    %225 = tpu.matmul %224, %1, %cst_40 {dimension_numbers = #tpu.dot_dimension_numbers<[1], [0], [0], [1], [0, 0, 1, 1], [], []>} : vector<8x128xbf16>, vector<128x384xbf16>, vector<8x384xf32> -> vector<8x384xf32>
    %226 = vector.extract_strided_slice %223 {offsets = [0, 0], sizes = [8, 128], strides = [1, 1]} : vector<8x384xf32> to vector<8x128xf32>
    %227 = vector.extract_strided_slice %225 {offsets = [0, 0], sizes = [8, 128], strides = [1, 1]} : vector<8x384xf32> to vector<8x128xf32>
    %228 = arith.addf %226, %227 : vector<8x128xf32>
    %229 = arith.negf %228 : vector<8x128xf32>
    %230 = math.exp %229 : vector<8x128xf32>
    %cst_41 = arith.constant 1.000000e+00 : f32
    %231 = vector.broadcast %cst_41 : f32 to vector<8x128xf32>
    %232 = arith.addf %231, %230 : vector<8x128xf32>
    %233 = arith.divf %231, %232 : vector<8x128xf32>
    %234 = vector.extract_strided_slice %223 {offsets = [0, 128], sizes = [8, 128], strides = [1, 1]} : vector<8x384xf32> to vector<8x128xf32>
    %235 = vector.extract_strided_slice %225 {offsets = [0, 128], sizes = [8, 128], strides = [1, 1]} : vector<8x384xf32> to vector<8x128xf32>
    %236 = arith.addf %234, %235 : vector<8x128xf32>
    %237 = arith.negf %236 : vector<8x128xf32>
    %238 = math.exp %237 : vector<8x128xf32>
    %cst_42 = arith.constant 1.000000e+00 : f32
    %239 = vector.broadcast %cst_42 : f32 to vector<8x128xf32>
    %240 = arith.addf %239, %238 : vector<8x128xf32>
    %241 = arith.divf %239, %240 : vector<8x128xf32>
    %242 = vector.extract_strided_slice %223 {offsets = [0, 256], sizes = [8, 128], strides = [1, 1]} : vector<8x384xf32> to vector<8x128xf32>
    %243 = vector.extract_strided_slice %225 {offsets = [0, 256], sizes = [8, 128], strides = [1, 1]} : vector<8x384xf32> to vector<8x128xf32>
    %244 = vector.broadcast %2 : vector<1x128xf32> to vector<8x128xf32>
    %245 = arith.addf %243, %244 : vector<8x128xf32>
    %246 = arith.mulf %233, %245 : vector<8x128xf32>
    %247 = arith.addf %242, %246 : vector<8x128xf32>
    %248 = math.tanh %247 : vector<8x128xf32>
    %249 = arith.subf %220, %248 : vector<8x128xf32>
    %250 = arith.mulf %241, %249 : vector<8x128xf32>
    %251 = arith.addf %248, %250 : vector<8x128xf32>
    %c8_i32 = arith.constant 8 : i32
    %c0_43 = arith.constant 0 : index
    %c0_44 = arith.constant 0 : index
    %252 = vector.load %arg3[%c0_43, %c0_44] : memref<8x128xf32, #tpu.memory_space<vmem>>, vector<8x128xf32>
    tpu.vector_store %arg3[%c0_43, %c0_44], %251 {strides = array<i32>} : memref<8x128xf32, #tpu.memory_space<vmem>>, vector<8x128xf32>,
    return
  }
}

</mosaic_0001>

<bundles_post_ra>
// kernel: gru_model_forward.1
= control target key start
LH: loop header
LB: loop body
LE: loop exit
PB: predicated region body
PF: predicated region fallthrough
CT: control target
= control target key end

     0   :  { %v1306_v3 = vmov 0.0   ;;  %v1307_v4 = vmov 0   ;;  %vm1308_vm0 = vmmov 0   ;;  %s1921_s1 = inlined_call_operand.vmem [shape: f32[128,384], index: 1, kind: input, shape index: {}]   ;;  %s1922_s0 = inlined_call_operand.vmem [shape: f32[8,8,384], index: 0, kind: input, shape index: {}]   ;;  %s1923_s2 = inlined_call_operand.vmem [shape: f32[1,128], index: 2, kind: input, shape index: {}]   ;;  %s1924_s3 = inlined_call_operand.vmem [shape: f32[8,128], index: 3, kind: output, shape index: {}]  }
   0x1   :  { %v58_v0 = vld [vmem:[%s1921_s1 + $0x158] sm:$0xff]  ;;  %v61_v1 = vld [vmem:[%s1921_s1 + $0x170] sm:$0xff]  ;;  %1063 = vmatprep.subr.bf16.mxu1 %v1306_v3  ;;  %123 = vmatprep.mubr.bf16.mxu0 %v1307_v4  ;;  %v60_v6 = vld [vmem:[%s1921_s1 + $0x168] sm:$0xff] }
   0x2   :  { %v57_v2 = vld [vmem:[%s1921_s1 + $0x150] sm:$0xff]  ;;  %v1340_v5 = vpack.c.bf16 %v61_v1, %v58_v0  ;;  %v52_v7 = vld [vmem:[%s1921_s1 + $0x128] sm:$0xff]  ;;  %v55_v8 = vld [vmem:[%s1921_s1 + $0x140] sm:$0xff]  ;;  %1079 = vmatprep.mubr.msk.bf16.mxu1 %vm1308_vm0, %v1306_v3 }
   0x3   :  { %v1353_v9 = vpack.c.bf16 %v60_v6, %v57_v2  ;;  %v1355_v10 = vpack.c.bf16 %v55_v8, %v52_v7  ;;  %v51_v11 = vld [vmem:[%s1921_s1 + $0x120] sm:$0xff]  ;;  %v54_v12 = vld [vmem:[%s1921_s1 + $0x138] sm:$0xff]  ;;  %v49_v14 = vld [vmem:[%s1921_s1 + $0x110] sm:$0xff] }
   0x4   :  { %v46_v13 = vld [vmem:[%s1921_s1 + $0xf8] sm:$0xff]  ;;  %91 = vmatprep.subr.bf16.mxu0 %v1340_v5  ;;  %v1371_v15 = vpack.c.bf16 %v54_v12, %v51_v11  ;;  %v45_v17 = vld [vmem:[%s1921_s1 + $0xf0] sm:$0xff]  ;;  %v48_v18 = vld [vmem:[%s1921_s1 + $0x108] sm:$0xff] }
   0x5   :  { %92 = vmatpush1.bf16.msra.mxu0 %v1353_v9  ;;  %v1374_v16 = vpack.c.bf16 %v49_v14, %v46_v13  ;;  %v40_v19 = vld [vmem:[%s1921_s1 + $0xc8] sm:$0xff]  ;;  %v43_v20 = vld [vmem:[%s1921_s1 + $0xe0] sm:$0xff]  ;;  %v1389_v21 = vpack.c.bf16 %v48_v18, %v45_v17  ;;  %v42_v24 = vld [vmem:[%s1921_s1 + $0xd8] sm:$0xff] }
   0x6   :  { %93 = vmatprep.subr.bf16.mxu0 %v1355_v10  ;;  %v39_v22 = vld [vmem:[%s1921_s1 + $0xc0] sm:$0xff]  ;;  %v1395_v23 = vpack.c.bf16 %v43_v20, %v40_v19  ;;  %v62_v26 = vld [vmem:[%s1921_s1 + $0x178] sm:$0xff]  ;;  %v37_v28 = vld [vmem:[%s1921_s1 + $0xb0] sm:$0xff] }
   0x7   :  { %v59_v25 = vld [vmem:[%s1921_s1 + $0x160] sm:$0xff]  ;;  %v34_v27 = vld [vmem:[%s1921_s1 + $0x98] sm:$0xff]  ;;  %v53_v30 = vld [vmem:[%s1921_s1 + $0x130] sm:$0xff]  ;;  %v1421_v32 = vpack.c.bf16 %v42_v24, %v39_v22 }
   0x8   :  { %v1412_v29 = vpack.c.bf16 %v62_v26, %v59_v25  ;;  %v56_v31 = vld [vmem:[%s1921_s1 + $0x148] sm:$0xff]  ;;  %v33_v33 = vld [vmem:[%s1921_s1 + $0x90] sm:$0xff]  ;;  %v1430_v35 = vpack.c.bf16 %v37_v28, %v34_v27  ;;  %v47_v37 = vld [vmem:[%s1921_s1 + $0x100] sm:$0xff] }
   0x9   :  { %94 = vmatpush1.bf16.msra.mxu0 %v1371_v15  ;;  %v1427_v34 = vpack.c.bf16 %v56_v31, %v53_v30  ;;  %v36_v36 = vld [vmem:[%s1921_s1 + $0xa8] sm:$0xff]  ;;  %v50_v38 = vld [vmem:[%s1921_s1 + $0x118] sm:$0xff]  ;;  %v31_v40 = vld [vmem:[%s1921_s1 + $0x80] sm:$0xff] }
   0xa   :  { %95 = vmatprep.subr.bf16.mxu0 %v1374_v16  ;;  %1064 = vmatpush3.bf16.msra.mxu1 %v1412_v29  ;;  %v28_v39 = vld [vmem:[%s1921_s1 + $0x68] sm:$0xff]  ;;  %v1449_v41 = vpack.c.bf16 %v36_v36, %v33_v33  ;;  %v27_v42 = vld [vmem:[%s1921_s1 + $0x60] sm:$0xff]  ;;  %v1455_v43 = vpack.c.bf16 %v50_v38, %v47_v37  ;;  %v30_v45 = vld [vmem:[%s1921_s1 + $0x78] sm:$0xff] }
   0xb   :  { %1065 = vmatprep.subr.bf16.mxu1 %v1306_v3  ;;  %v1458_v44 = vpack.c.bf16 %v31_v40, %v28_v39  ;;  %v41_v46 = vld [vmem:[%s1921_s1 + $0xd0] sm:$0xff]  ;;  %v44_v47 = vld [vmem:[%s1921_s1 + $0xe8] sm:$0xff]  ;;  %v22_v48 = vld [vmem:[%s1921_s1 + $0x38] sm:$0xff]  ;;  %v1477_v50 = vpack.c.bf16 %v30_v45, %v27_v42 }
   0xc   :  { %v25_v49 = vld [vmem:[%s1921_s1 + $0x50] sm:$0xff]  ;;  %v1483_v52 = vpack.c.bf16 %v44_v47, %v41_v46  ;;  %v24_v54 = vld [vmem:[%s1921_s1 + $0x48] sm:$0xff]  ;;  %v35_v55 = vld [vmem:[%s1921_s1 + $0xa0] sm:$0xff] }
   0xd   :  { %96 = vmatpush1.bf16.msra.mxu0 %v1389_v21  ;;  %v21_v51 = vld [vmem:[%s1921_s1 + $0x30] sm:$0xff]  ;;  %v1486_v53 = vpack.c.bf16 %v25_v49, %v22_v48  ;;  %v38_v56 = vld [vmem:[%s1921_s1 + $0xb8] sm:$0xff]  ;;  %v16_v57 = vld [vmem:[%s1921_s1 + $0x8] sm:$0xff] }
   0xe   :  { %97 = vmatprep.subr.bf16.mxu0 %v1395_v23  ;;  %1066 = vmatpush3.bf16.msra.mxu1 %v1427_v34  ;;  %v19_v58 = vld [vmem:[%s1921_s1 + $0x20] sm:$0xff]  ;;  %v1505_v59 = vpack.c.bf16 %v24_v54, %v21_v51  ;;  %v1511_v61 = vpack.c.bf16 %v38_v56, %v35_v55  ;;  %v18_v63 = vld [vmem:[%s1921_s1 + $0x18] sm:$0xff]  ;;  %v29_v0 = vld [vmem:[%s1921_s1 + $0x70] sm:$0xff] }
   0xf   :  { %1067 = vmatprep.subr.bf16.mxu1 %v1306_v3  ;;  %v15_v60 = vld [vmem:[%s1921_s1] sm:$0xff]  ;;  %v1514_v62 = vpack.c.bf16 %v19_v58, %v16_v57  ;;  %v32_v1 = vld [vmem:[%s1921_s1 + $0x88] sm:$0xff]  ;;  %v26_v8 = vld [vmem:[%s1921_s1 + $0x58] sm:$0xff] }
  0x10   :  { %v1527_v2 = vpack.c.bf16 %v18_v63, %v15_v60  ;;  %v1530_v6 = vpack.c.bf16 %v32_v1, %v29_v0  ;;  %v23_v7 = vld [vmem:[%s1921_s1 + $0x40] sm:$0xff]  ;;  %v17_v12 = vld [vmem:[%s1921_s1 + $0x10] sm:$0xff]  ;;  %v20_v13 = vld [vmem:[%s1921_s1 + $0x28] sm:$0xff] }
  0x11   :  { %98 = vmatpush1.bf16.msra.mxu0 %v1421_v32  ;;  %v1542_v11 = vpack.c.bf16 %v26_v8, %v23_v7  ;;  %v1554_v14 = vpack.c.bf16 %v20_v13, %v17_v12  ;;  %v88_v17 = vld [vmem:[%s1922_s0] sm:$0xff]  ;;  %v89_v27 = vld [vmem:[%s1922_s0 + $0x8] sm:$0xff]  ;;  %v90_v46 = vld [vmem:[%s1922_s0 + $0x10] sm:$0xff] }
  0x12   :  { %99 = vmatprep.subr.bf16.mxu0 %v1430_v35  ;;  %1068 = vmatpush3.bf16.msra.mxu1 %v1455_v43  ;;  %v1604_v39 = vld [vmem:[%s1923_s2] ss:$0 sm:$0xff]  ;;  %v956_v60 = vld [vmem:[%s1922_s0 + $0x18] sm:$0xff] }
  0x13   :  { %1069 = vmatprep.subr.bf16.mxu1 %v1306_v3 }
  0x15   :  { %100 = vmatpush1.bf16.msra.mxu0 %v1449_v41 }
  0x16   :  { %101 = vmatprep.subr.bf16.mxu0 %v1458_v44  ;;  %1070 = vmatpush3.bf16.msra.mxu1 %v1483_v52 }
  0x17   :  { %1071 = vmatprep.subr.bf16.mxu1 %v1306_v3 }
  0x19   :  { %102 = vmatpush1.bf16.msra.mxu0 %v1477_v50 }
  0x1a   :  { %103 = vmatprep.subr.bf16.mxu0 %v1486_v53  ;;  %1072 = vmatpush3.bf16.msra.mxu1 %v1511_v61 }
  0x1b   :  { %1073 = vmatprep.subr.bf16.mxu1 %v1306_v3 }
  0x1d   :  { %104 = vmatpush1.bf16.msra.mxu0 %v1505_v59 }
  0x1e   :  { %105 = vmatprep.subr.bf16.mxu0 %v1514_v62  ;;  %1074 = vmatpush3.bf16.msra.mxu1 %v1530_v6 }
  0x1f   :  { %1075 = vmatprep.subr.bf16.mxu1 %v1306_v3 }
  0x21   :  { %106 = vmatpush1.bf16.msra.mxu0 %v1527_v2 }
  0x22   :  { %204 = vmatprep.subr.bf16.mxu0 %v1340_v5  ;;  %1076 = vmatpush3.bf16.msra.mxu1 %v1542_v11 }
  0x23   :  { %1077 = vmatprep.subr.bf16.mxu1 %v1306_v3 }
  0x24   :  { %124 = vmatmul.mubr.bf16.vlgmr.msra.gmra.mxu0 %v1307_v4 }
  0x25   :  { %205 = vmatpush1.bf16.msra.mxu0 %v1353_v9  ;;  %236 = vmatprep.mubr.bf16.mxu0 %v1307_v4 }
  0x26   :  { %206 = vmatprep.subr.bf16.mxu0 %v1355_v10  ;;  %1078 = vmatpush3.bf16.msra.mxu1 %v1554_v14 }
  0x27   :  { %1083 = vmatprep.subr.bf16.mxu1 %v1306_v3 }
  0x29   :  { %207 = vmatpush1.bf16.msra.mxu0 %v1371_v15  ;;  %1080 = vmatmul.mubr.bf16.vlgmr.msra.gmra.mxu1 %v1307_v4 }
  0x2a   :  { %208 = vmatprep.subr.bf16.mxu0 %v1374_v16  ;;  %1084 = vmatpush3.bf16.msra.mxu1 %v1412_v29 }
  0x2b   :  { %1085 = vmatprep.subr.bf16.mxu1 %v1306_v3  ;;  %1099 = vmatprep.mubr.msk.bf16.mxu1 %vm1308_vm0, %v1306_v3 }
  0x2d   :  { %209 = vmatpush1.bf16.msra.mxu0 %v1389_v21 }
  0x2e   :  { %210 = vmatprep.subr.bf16.mxu0 %v1395_v23  ;;  %1086 = vmatpush3.bf16.msra.mxu1 %v1427_v34 }
  0x2f   :  { %1087 = vmatprep.subr.bf16.mxu1 %v1306_v3 }
  0x31   :  { %211 = vmatpush1.bf16.msra.mxu0 %v1421_v32 }
  0x32   :  { %212 = vmatprep.subr.bf16.mxu0 %v1430_v35  ;;  %1088 = vmatpush3.bf16.msra.mxu1 %v1455_v43 }
  0x33   :  { %1089 = vmatprep.subr.bf16.mxu1 %v1306_v3 }
  0x35   :  { %213 = vmatpush1.bf16.msra.mxu0 %v1449_v41 }
  0x36   :  { %214 = vmatprep.subr.bf16.mxu0 %v1458_v44  ;;  %1090 = vmatpush3.bf16.msra.mxu1 %v1483_v52 }
  0x37   :  { %1091 = vmatprep.subr.bf16.mxu1 %v1306_v3 }
  0x39   :  { %215 = vmatpush1.bf16.msra.mxu0 %v1477_v50 }
  0x3a   :  { %216 = vmatprep.subr.bf16.mxu0 %v1486_v53  ;;  %1092 = vmatpush3.bf16.msra.mxu1 %v1511_v61 }
  0x3b   :  { %1093 = vmatprep.subr.bf16.mxu1 %v1306_v3 }
  0x3d   :  { %217 = vmatpush1.bf16.msra.mxu0 %v1505_v59 }
  0x3e   :  { %218 = vmatprep.subr.bf16.mxu0 %v1514_v62  ;;  %1094 = vmatpush3.bf16.msra.mxu1 %v1530_v6 }
  0x3f   :  { %1095 = vmatprep.subr.bf16.mxu1 %v1306_v3 }
  0x41   :  { %219 = vmatpush1.bf16.msra.mxu0 %v1527_v2 }
  0x42   :  { %311 = vmatprep.subr.bf16.mxu0 %v1340_v5  ;;  %1096 = vmatpush3.bf16.msra.mxu1 %v1542_v11 }
  0x43   :  { %1097 = vmatprep.subr.bf16.mxu1 %v1306_v3 }
  0x46   :  { %1098 = vmatpush3.bf16.msra.mxu1 %v1554_v14 }
  0x47   :  { %1103 = vmatprep.subr.bf16.mxu1 %v1306_v3 }
  0xe4   :  { %v125_v18 = vpop.f32.mrf.mxu0 }
  0xe5   :  { %v172_v19 = vadd.f32 %v125_v18, %v88_v17 }
  0xe6   :  { %v127_v20 = vpop.f32.mrf.mxu0 }
  0xe7   :  { %v953_v22 = vmul.f32 -1.442695, %v172_v19  ;;  %v179_v30 = vadd.f32 %v127_v20, %v89_v27  ;;  %v957_v20 = vld [vmem:[%s1922_s0 + $0x20] sm:$0xff] }
  0xe8   :  { %v129_v24 = vpop.f32.mrf.mxu0 }
  0xe9   :  { %1226 = vpow2.f32 %v953_v22  ;;  %v166_v26 = vpop.f32.mrf.mxu1  ;;  %v954_v36 = vmul.f32 -1.442695, %v179_v30 }
  0xea   :  { %v130_v25 = vpop.f32.mrf.mxu0  ;;  %v192_v40 = vadd.f32 %v1604_v39, %v166_v26 }
  0xeb   :  { %v1081_v28 = vpop.f32.mrf.mxu1  ;;  %1228 = vpow2.f32 %v954_v36 }
  0xed   :  { %v169_v31 = vpop.f32.mrf.mxu1 }
  0xee   :  { %v958_v31 = vld [vmem:[%s1922_s0 + $0x28] sm:$0xff] }
  0xef   :  { %v1082_v33 = vpop.f32.mrf.mxu1 }
  0xf6   :  { %v1227_v37 = vpop.eup %1226 }
  0xf7   :  { %v176_v38 = vadd.f32 1.0, %v1227_v37 }
  0xf8   :  { %v1229_v42 = vpop.eup %1228 }
  0xf9   :  { %1230 = vrcp.f32 %v176_v38  ;;  %v183_v48 = vadd.f32 1.0, %v1229_v42 }
 0x106   :  { %v1231_v45 = vpop.eup %1230 }
 0x107   :  { %v193_v47 = vmul.f32 %v1231_v45, %v192_v40 }
 0x109   :  { %v194_v49 = vadd.f32 %v193_v47, %v90_v46 }
 0x10b   :  { %1232 = vtanh.f32 %v194_v49 }
 0x10c   :  { %1234 = vrcp.f32 %v183_v48  ;;  %v961_v48 = vld [vmem:[%s1922_s0 + $0x30] sm:$0xff] }
 0x118   :  { %v1233_v51 = vpop.eup %1232 }
 0x119   :  { %v196_v54 = vsub.f32 0.0, %v1233_v51  ;;  %v1235_v55 = vpop.eup %1234 }
 0x11b   :  { %v197_v56 = vmul.f32 %v1235_v55, %v196_v54 }
 0x11d   :  { %v1610_v57 = vadd.f32 %v1233_v51, %v197_v56 }
 0x11f   :  { %v203_v58 = vpack.c.bf16 %v1610_v57, %v1610_v57 }
 0x121   :  { %237 = vmatmul.mubr.bf16.vlgmr.msra.gmra.mxu0 %v203_v58  ;;  %1100 = vmatmul.mubr.bf16.vlgmr.msra.gmra.mxu1 %v203_v58 }
 0x122   :  { %312 = vmatpush1.bf16.msra.mxu0 %v1353_v9  ;;  %1104 = vmatpush3.bf16.msra.mxu1 %v1412_v29 }
 0x123   :  { %313 = vmatprep.subr.bf16.mxu0 %v1355_v10  ;;  %1105 = vmatprep.subr.bf16.mxu1 %v1306_v3 }
 0x124   :  { %343 = vmatprep.mubr.bf16.mxu0 %v1307_v4  ;;  %1119 = vmatprep.mubr.msk.bf16.mxu1 %vm1308_vm0, %v1306_v3 }
 0x126   :  { %314 = vmatpush1.bf16.msra.mxu0 %v1371_v15  ;;  %1106 = vmatpush3.bf16.msra.mxu1 %v1427_v34 }
 0x127   :  { %315 = vmatprep.subr.bf16.mxu0 %v1374_v16  ;;  %1107 = vmatprep.subr.bf16.mxu1 %v1306_v3 }
 0x12a   :  { %316 = vmatpush1.bf16.msra.mxu0 %v1389_v21  ;;  %1108 = vmatpush3.bf16.msra.mxu1 %v1455_v43 }
 0x12b   :  { %317 = vmatprep.subr.bf16.mxu0 %v1395_v23  ;;  %1109 = vmatprep.subr.bf16.mxu1 %v1306_v3 }
 0x12e   :  { %318 = vmatpush1.bf16.msra.mxu0 %v1421_v32  ;;  %1110 = vmatpush3.bf16.msra.mxu1 %v1483_v52 }
 0x12f   :  { %319 = vmatprep.subr.bf16.mxu0 %v1430_v35  ;;  %1111 = vmatprep.subr.bf16.mxu1 %v1306_v3 }
 0x132   :  { %320 = vmatpush1.bf16.msra.mxu0 %v1449_v41  ;;  %1112 = vmatpush3.bf16.msra.mxu1 %v1511_v61 }
 0x133   :  { %321 = vmatprep.subr.bf16.mxu0 %v1458_v44  ;;  %1113 = vmatprep.subr.bf16.mxu1 %v1306_v3 }
 0x136   :  { %322 = vmatpush1.bf16.msra.mxu0 %v1477_v50  ;;  %1114 = vmatpush3.bf16.msra.mxu1 %v1530_v6 }
 0x137   :  { %323 = vmatprep.subr.bf16.mxu0 %v1486_v53  ;;  %1115 = vmatprep.subr.bf16.mxu1 %v1306_v3 }
 0x13a   :  { %324 = vmatpush1.bf16.msra.mxu0 %v1505_v59  ;;  %1116 = vmatpush3.bf16.msra.mxu1 %v1542_v11 }
 0x13b   :  { %325 = vmatprep.subr.bf16.mxu0 %v1514_v62  ;;  %1117 = vmatprep.subr.bf16.mxu1 %v1306_v3 }
 0x13e   :  { %326 = vmatpush1.bf16.msra.mxu0 %v1527_v2  ;;  %1118 = vmatpush3.bf16.msra.mxu1 %v1554_v14 }
 0x13f   :  { %418 = vmatprep.subr.bf16.mxu0 %v1340_v5  ;;  %1123 = vmatprep.subr.bf16.mxu1 %v1306_v3 }
 0x1e1   :  { %v238_v63 = vpop.f32.mrf.mxu0  ;;  %v279_v0 = vpop.f32.mrf.mxu1 }
 0x1e2   :  { %v285_v1 = vadd.f32 %v956_v60, %v238_v63  ;;  %v299_v28 = vadd.f32 %v1604_v39, %v279_v0 }
 0x1e3   :  { %v240_v7 = vpop.f32.mrf.mxu0  ;;  %v1101_v8 = vpop.f32.mrf.mxu1 }
 0x1e4   :  { %v959_v12 = vmul.f32 -1.442695, %v285_v1  ;;  %v292_v22 = vadd.f32 %v957_v20, %v240_v7  ;;  %v962_v1 = vld [vmem:[%s1922_s0 + $0x38] sm:$0xff]  ;;  %v963_v20 = vld [vmem:[%s1922_s0 + $0x40] sm:$0xff] }
 0x1e5   :  { %v242_v13 = vpop.f32.mrf.mxu0  ;;  %v282_v17 = vpop.f32.mrf.mxu1 }
 0x1e6   :  { %1236 = vpow2.f32 %v959_v12  ;;  %v960_v24 = vmul.f32 -1.442695, %v292_v22 }
 0x1e7   :  { %v243_v18 = vpop.f32.mrf.mxu0  ;;  %v1102_v19 = vpop.f32.mrf.mxu1 }
 0x1e8   :  { %1238 = vpow2.f32 %v960_v24 }
 0x1f3   :  { %v1237_v25 = vpop.eup %1236 }
 0x1f4   :  { %v289_v26 = vadd.f32 1.0, %v1237_v25 }
 0x1f5   :  { %v1239_v27 = vpop.eup %1238 }
 0x1f6   :  { %1240 = vrcp.f32 %v289_v26  ;;  %v296_v37 = vadd.f32 1.0, %v1239_v27 }
 0x203   :  { %v1241_v30 = vpop.eup %1240 }
 0x204   :  { %v300_v33 = vmul.f32 %v1241_v30, %v299_v28 }
 0x206   :  { %v301_v36 = vadd.f32 %v958_v31, %v300_v33 }
 0x208   :  { %1242 = vtanh.f32 %v301_v36  ;;  %v966_v36 = vld [vmem:[%s1922_s0 + $0x48] sm:$0xff] }
 0x209   :  { %1244 = vrcp.f32 %v296_v37 }
 0x215   :  { %v1243_v38 = vpop.eup %1242 }
 0x216   :  { %v303_v40 = vsub.f32 %v1610_v57, %v1243_v38  ;;  %v1245_v42 = vpop.eup %1244 }
 0x218   :  { %v304_v45 = vmul.f32 %v1245_v42, %v303_v40 }
 0x21a   :  { %v1660_v46 = vadd.f32 %v1243_v38, %v304_v45 }
 0x21c   :  { %v310_v47 = vpack.c.bf16 %v1660_v46, %v1660_v46 }
 0x21e   :  { %344 = vmatmul.mubr.bf16.vlgmr.msra.gmra.mxu0 %v310_v47  ;;  %1120 = vmatmul.mubr.bf16.vlgmr.msra.gmra.mxu1 %v310_v47 }
 0x21f   :  { %419 = vmatpush1.bf16.msra.mxu0 %v1353_v9  ;;  %1124 = vmatpush3.bf16.msra.mxu1 %v1412_v29 }
 0x220   :  { %420 = vmatprep.subr.bf16.mxu0 %v1355_v10  ;;  %1125 = vmatprep.subr.bf16.mxu1 %v1306_v3 }
 0x221   :  { %450 = vmatprep.mubr.bf16.mxu0 %v1307_v4  ;;  %1139 = vmatprep.mubr.msk.bf16.mxu1 %vm1308_vm0, %v1306_v3 }
 0x223   :  { %421 = vmatpush1.bf16.msra.mxu0 %v1371_v15  ;;  %1126 = vmatpush3.bf16.msra.mxu1 %v1427_v34 }
 0x224   :  { %422 = vmatprep.subr.bf16.mxu0 %v1374_v16  ;;  %1127 = vmatprep.subr.bf16.mxu1 %v1306_v3 }
 0x227   :  { %423 = vmatpush1.bf16.msra.mxu0 %v1389_v21  ;;  %1128 = vmatpush3.bf16.msra.mxu1 %v1455_v43 }
 0x228   :  { %424 = vmatprep.subr.bf16.mxu0 %v1395_v23  ;;  %1129 = vmatprep.subr.bf16.mxu1 %v1306_v3 }
 0x22b   :  { %425 = vmatpush1.bf16.msra.mxu0 %v1421_v32  ;;  %1130 = vmatpush3.bf16.msra.mxu1 %v1483_v52 }
 0x22c   :  { %426 = vmatprep.subr.bf16.mxu0 %v1430_v35  ;;  %1131 = vmatprep.subr.bf16.mxu1 %v1306_v3 }
 0x22f   :  { %427 = vmatpush1.bf16.msra.mxu0 %v1449_v41  ;;  %1132 = vmatpush3.bf16.msra.mxu1 %v1511_v61 }
 0x230   :  { %428 = vmatprep.subr.bf16.mxu0 %v1458_v44  ;;  %1133 = vmatprep.subr.bf16.mxu1 %v1306_v3 }
 0x233   :  { %429 = vmatpush1.bf16.msra.mxu0 %v1477_v50  ;;  %1134 = vmatpush3.bf16.msra.mxu1 %v1530_v6 }
 0x234   :  { %430 = vmatprep.subr.bf16.mxu0 %v1486_v53  ;;  %1135 = vmatprep.subr.bf16.mxu1 %v1306_v3 }
 0x237   :  { %431 = vmatpush1.bf16.msra.mxu0 %v1505_v59  ;;  %1136 = vmatpush3.bf16.msra.mxu1 %v1542_v11 }
 0x238   :  { %432 = vmatprep.subr.bf16.mxu0 %v1514_v62  ;;  %1137 = vmatprep.subr.bf16.mxu1 %v1306_v3 }
 0x23b   :  { %433 = vmatpush1.bf16.msra.mxu0 %v1527_v2  ;;  %1138 = vmatpush3.bf16.msra.mxu1 %v1554_v14 }
 0x23c   :  { %525 = vmatprep.subr.bf16.mxu0 %v1340_v5  ;;  %1143 = vmatprep.subr.bf16.mxu1 %v1306_v3 }
 0x2de   :  { %v345_v49 = vpop.f32.mrf.mxu0  ;;  %v386_v51 = vpop.f32.mrf.mxu1 }
 0x2df   :  { %v392_v54 = vadd.f32 %v961_v48, %v345_v49  ;;  %v406_v18 = vadd.f32 %v1604_v39, %v386_v51 }
 0x2e0   :  { %v347_v55 = vpop.f32.mrf.mxu0  ;;  %v1121_v56 = vpop.f32.mrf.mxu1 }
 0x2e1   :  { %v964_v57 = vmul.f32 -1.442695, %v392_v54  ;;  %v399_v7 = vadd.f32 %v962_v1, %v347_v55  ;;  %v967_v54 = vld [vmem:[%s1922_s0 + $0x50] sm:$0xff]  ;;  %v968_v1 = vld [vmem:[%s1922_s0 + $0x58] sm:$0xff] }
 0x2e2   :  { %v349_v58 = vpop.f32.mrf.mxu0  ;;  %v389_v60 = vpop.f32.mrf.mxu1 }
 0x2e3   :  { %1246 = vpow2.f32 %v964_v57  ;;  %v965_v8 = vmul.f32 -1.442695, %v399_v7 }
 0x2e4   :  { %v350_v63 = vpop.f32.mrf.mxu0  ;;  %v1122_v0 = vpop.f32.mrf.mxu1 }
 0x2e5   :  { %1248 = vpow2.f32 %v965_v8 }
 0x2f0   :  { %v1247_v12 = vpop.eup %1246 }
 0x2f1   :  { %v396_v13 = vadd.f32 1.0, %v1247_v12 }
 0x2f2   :  { %v1249_v17 = vpop.eup %1248 }
 0x2f3   :  { %1250 = vrcp.f32 %v396_v13  ;;  %v403_v25 = vadd.f32 1.0, %v1249_v17 }
 0x300   :  { %v1251_v19 = vpop.eup %1250 }
 0x301   :  { %v407_v22 = vmul.f32 %v1251_v19, %v406_v18 }
 0x303   :  { %v408_v24 = vadd.f32 %v963_v20, %v407_v22 }
 0x305   :  { %1252 = vtanh.f32 %v408_v24  ;;  %v971_v24 = vld [vmem:[%s1922_s0 + $0x60] sm:$0xff] }
 0x306   :  { %1254 = vrcp.f32 %v403_v25 }
 0x312   :  { %v1253_v26 = vpop.eup %1252 }
 0x313   :  { %v410_v27 = vsub.f32 %v1660_v46, %v1253_v26  ;;  %v1255_v28 = vpop.eup %1254 }
 0x315   :  { %v411_v30 = vmul.f32 %v1255_v28, %v410_v27 }
 0x317   :  { %v1710_v31 = vadd.f32 %v1253_v26, %v411_v30 }
 0x319   :  { %v417_v33 = vpack.c.bf16 %v1710_v31, %v1710_v31 }
 0x31b   :  { %451 = vmatmul.mubr.bf16.vlgmr.msra.gmra.mxu0 %v417_v33  ;;  %1140 = vmatmul.mubr.bf16.vlgmr.msra.gmra.mxu1 %v417_v33 }
 0x31c   :  { %526 = vmatpush1.bf16.msra.mxu0 %v1353_v9  ;;  %1144 = vmatpush3.bf16.msra.mxu1 %v1412_v29 }
 0x31d   :  { %527 = vmatprep.subr.bf16.mxu0 %v1355_v10  ;;  %1145 = vmatprep.subr.bf16.mxu1 %v1306_v3 }
 0x31e   :  { %557 = vmatprep.mubr.bf16.mxu0 %v1307_v4  ;;  %1159 = vmatprep.mubr.msk.bf16.mxu1 %vm1308_vm0, %v1306_v3 }
 0x320   :  { %528 = vmatpush1.bf16.msra.mxu0 %v1371_v15  ;;  %1146 = vmatpush3.bf16.msra.mxu1 %v1427_v34 }
 0x321   :  { %529 = vmatprep.subr.bf16.mxu0 %v1374_v16  ;;  %1147 = vmatprep.subr.bf16.mxu1 %v1306_v3 }
 0x324   :  { %530 = vmatpush1.bf16.msra.mxu0 %v1389_v21  ;;  %1148 = vmatpush3.bf16.msra.mxu1 %v1455_v43 }
 0x325   :  { %531 = vmatprep.subr.bf16.mxu0 %v1395_v23  ;;  %1149 = vmatprep.subr.bf16.mxu1 %v1306_v3 }
 0x328   :  { %532 = vmatpush1.bf16.msra.mxu0 %v1421_v32  ;;  %1150 = vmatpush3.bf16.msra.mxu1 %v1483_v52 }
 0x329   :  { %533 = vmatprep.subr.bf16.mxu0 %v1430_v35  ;;  %1151 = vmatprep.subr.bf16.mxu1 %v1306_v3 }
 0x32c   :  { %534 = vmatpush1.bf16.msra.mxu0 %v1449_v41  ;;  %1152 = vmatpush3.bf16.msra.mxu1 %v1511_v61 }
 0x32d   :  { %535 = vmatprep.subr.bf16.mxu0 %v1458_v44  ;;  %1153 = vmatprep.subr.bf16.mxu1 %v1306_v3 }
 0x330   :  { %536 = vmatpush1.bf16.msra.mxu0 %v1477_v50  ;;  %1154 = vmatpush3.bf16.msra.mxu1 %v1530_v6 }
 0x331   :  { %537 = vmatprep.subr.bf16.mxu0 %v1486_v53  ;;  %1155 = vmatprep.subr.bf16.mxu1 %v1306_v3 }
 0x334   :  { %538 = vmatpush1.bf16.msra.mxu0 %v1505_v59  ;;  %1156 = vmatpush3.bf16.msra.mxu1 %v1542_v11 }
 0x335   :  { %539 = vmatprep.subr.bf16.mxu0 %v1514_v62  ;;  %1157 = vmatprep.subr.bf16.mxu1 %v1306_v3 }
 0x338   :  { %540 = vmatpush1.bf16.msra.mxu0 %v1527_v2  ;;  %1158 = vmatpush3.bf16.msra.mxu1 %v1554_v14 }
 0x339   :  { %632 = vmatprep.subr.bf16.mxu0 %v1340_v5  ;;  %1163 = vmatprep.subr.bf16.mxu1 %v1306_v3 }
 0x3db   :  { %v452_v37 = vpop.f32.mrf.mxu0  ;;  %v493_v38 = vpop.f32.mrf.mxu1 }
 0x3dc   :  { %v499_v40 = vadd.f32 %v966_v36, %v452_v37  ;;  %v513_v63 = vadd.f32 %v1604_v39, %v493_v38 }
 0x3dd   :  { %v454_v42 = vpop.f32.mrf.mxu0  ;;  %v1141_v45 = vpop.f32.mrf.mxu1 }
 0x3de   :  { %v969_v46 = vmul.f32 -1.442695, %v499_v40  ;;  %v506_v55 = vadd.f32 %v967_v54, %v454_v42  ;;  %v972_v40 = vld [vmem:[%s1922_s0 + $0x68] sm:$0xff]  ;;  %v973_v54 = vld [vmem:[%s1922_s0 + $0x70] sm:$0xff] }
 0x3df   :  { %v456_v47 = vpop.f32.mrf.mxu0  ;;  %v496_v48 = vpop.f32.mrf.mxu1 }
 0x3e0   :  { %1256 = vpow2.f32 %v969_v46  ;;  %v970_v56 = vmul.f32 -1.442695, %v506_v55 }
 0x3e1   :  { %v457_v49 = vpop.f32.mrf.mxu0  ;;  %v1142_v51 = vpop.f32.mrf.mxu1 }
 0x3e2   :  { %1258 = vpow2.f32 %v970_v56 }
 0x3ed   :  { %v1257_v57 = vpop.eup %1256 }
 0x3ee   :  { %v503_v58 = vadd.f32 1.0, %v1257_v57 }
 0x3ef   :  { %v1259_v60 = vpop.eup %1258 }
 0x3f0   :  { %1260 = vrcp.f32 %v503_v58  ;;  %v510_v12 = vadd.f32 1.0, %v1259_v60 }
 0x3fd   :  { %v1261_v0 = vpop.eup %1260 }
 0x3fe   :  { %v514_v7 = vmul.f32 %v1261_v0, %v513_v63 }
 0x400   :  { %v515_v8 = vadd.f32 %v968_v1, %v514_v7 }
 0x402   :  { %1262 = vtanh.f32 %v515_v8  ;;  %v976_v8 = vld [vmem:[%s1922_s0 + $0x78] sm:$0xff] }
 0x403   :  { %1264 = vrcp.f32 %v510_v12 }
 0x40f   :  { %v1263_v13 = vpop.eup %1262 }
 0x410   :  { %v517_v17 = vsub.f32 %v1710_v31, %v1263_v13  ;;  %v1265_v18 = vpop.eup %1264 }
 0x412   :  { %v518_v19 = vmul.f32 %v1265_v18, %v517_v17 }
 0x414   :  { %v1760_v20 = vadd.f32 %v1263_v13, %v518_v19 }
 0x416   :  { %v524_v22 = vpack.c.bf16 %v1760_v20, %v1760_v20 }
 0x418   :  { %558 = vmatmul.mubr.bf16.vlgmr.msra.gmra.mxu0 %v524_v22  ;;  %1160 = vmatmul.mubr.bf16.vlgmr.msra.gmra.mxu1 %v524_v22 }
 0x419   :  { %633 = vmatpush1.bf16.msra.mxu0 %v1353_v9  ;;  %1164 = vmatpush3.bf16.msra.mxu1 %v1412_v29 }
 0x41a   :  { %634 = vmatprep.subr.bf16.mxu0 %v1355_v10  ;;  %1165 = vmatprep.subr.bf16.mxu1 %v1306_v3 }
 0x41b   :  { %664 = vmatprep.mubr.bf16.mxu0 %v1307_v4  ;;  %1179 = vmatprep.mubr.msk.bf16.mxu1 %vm1308_vm0, %v1306_v3 }
 0x41d   :  { %635 = vmatpush1.bf16.msra.mxu0 %v1371_v15  ;;  %1166 = vmatpush3.bf16.msra.mxu1 %v1427_v34 }
 0x41e   :  { %636 = vmatprep.subr.bf16.mxu0 %v1374_v16  ;;  %1167 = vmatprep.subr.bf16.mxu1 %v1306_v3 }
 0x421   :  { %637 = vmatpush1.bf16.msra.mxu0 %v1389_v21  ;;  %1168 = vmatpush3.bf16.msra.mxu1 %v1455_v43 }
 0x422   :  { %638 = vmatprep.subr.bf16.mxu0 %v1395_v23  ;;  %1169 = vmatprep.subr.bf16.mxu1 %v1306_v3 }
 0x425   :  { %639 = vmatpush1.bf16.msra.mxu0 %v1421_v32  ;;  %1170 = vmatpush3.bf16.msra.mxu1 %v1483_v52 }
 0x426   :  { %640 = vmatprep.subr.bf16.mxu0 %v1430_v35  ;;  %1171 = vmatprep.subr.bf16.mxu1 %v1306_v3 }
 0x429   :  { %641 = vmatpush1.bf16.msra.mxu0 %v1449_v41  ;;  %1172 = vmatpush3.bf16.msra.mxu1 %v1511_v61 }
 0x42a   :  { %642 = vmatprep.subr.bf16.mxu0 %v1458_v44  ;;  %1173 = vmatprep.subr.bf16.mxu1 %v1306_v3 }
 0x42d   :  { %643 = vmatpush1.bf16.msra.mxu0 %v1477_v50  ;;  %1174 = vmatpush3.bf16.msra.mxu1 %v1530_v6 }
 0x42e   :  { %644 = vmatprep.subr.bf16.mxu0 %v1486_v53  ;;  %1175 = vmatprep.subr.bf16.mxu1 %v1306_v3 }
 0x431   :  { %645 = vmatpush1.bf16.msra.mxu0 %v1505_v59  ;;  %1176 = vmatpush3.bf16.msra.mxu1 %v1542_v11 }
 0x432   :  { %646 = vmatprep.subr.bf16.mxu0 %v1514_v62  ;;  %1177 = vmatprep.subr.bf16.mxu1 %v1306_v3 }
 0x435   :  { %647 = vmatpush1.bf16.msra.mxu0 %v1527_v2  ;;  %1178 = vmatpush3.bf16.msra.mxu1 %v1554_v14 }
 0x436   :  { %739 = vmatprep.subr.bf16.mxu0 %v1340_v5  ;;  %1183 = vmatprep.subr.bf16.mxu1 %v1306_v3 }
 0x4d8   :  { %v559_v25 = vpop.f32.mrf.mxu0  ;;  %v600_v26 = vpop.f32.mrf.mxu1 }
 0x4d9   :  { %v606_v27 = vadd.f32 %v971_v24, %v559_v25  ;;  %v620_v49 = vadd.f32 %v1604_v39, %v600_v26 }
 0x4da   :  { %v561_v28 = vpop.f32.mrf.mxu0  ;;  %v1161_v30 = vpop.f32.mrf.mxu1 }
 0x4db   :  { %v974_v31 = vmul.f32 -1.442695, %v606_v27  ;;  %v613_v42 = vadd.f32 %v972_v40, %v561_v28 }
 0x4dc   :  { %v563_v33 = vpop.f32.mrf.mxu0  ;;  %v603_v36 = vpop.f32.mrf.mxu1 }
 0x4dd   :  { %1266 = vpow2.f32 %v974_v31  ;;  %v975_v45 = vmul.f32 -1.442695, %v613_v42 }
 0x4de   :  { %v564_v37 = vpop.f32.mrf.mxu0  ;;  %v1162_v38 = vpop.f32.mrf.mxu1 }
 0x4df   :  { %1268 = vpow2.f32 %v975_v45  ;;  %v978_v38 = vld [vmem:[%s1922_s0 + $0x88] sm:$0xff] }
 0x4ea   :  { %v1267_v46 = vpop.eup %1266 }
 0x4eb   :  { %v610_v47 = vadd.f32 1.0, %v1267_v46 }
 0x4ec   :  { %v1269_v48 = vpop.eup %1268 }
 0x4ed   :  { %1270 = vrcp.f32 %v610_v47  ;;  %v617_v57 = vadd.f32 1.0, %v1269_v48 }
 0x4fa   :  { %v1271_v51 = vpop.eup %1270 }
 0x4fb   :  { %v621_v55 = vmul.f32 %v1271_v51, %v620_v49 }
 0x4fd   :  { %v622_v56 = vadd.f32 %v973_v54, %v621_v55 }
 0x4ff   :  { %1272 = vtanh.f32 %v622_v56 }
 0x500   :  { %1274 = vrcp.f32 %v617_v57 }
 0x50c   :  { %v1273_v58 = vpop.eup %1272 }
 0x50d   :  { %v624_v60 = vsub.f32 %v1760_v20, %v1273_v58  ;;  %v1275_v63 = vpop.eup %1274 }
 0x50f   :  { %v625_v0 = vmul.f32 %v1275_v63, %v624_v60  ;;  %v986_v60 = vld [vmem:[%s1922_s0 + $0xa8] sm:$0xff] }
 0x511   :  { %v1810_v1 = vadd.f32 %v1273_v58, %v625_v0 }
 0x513   :  { %v631_v7 = vpack.c.bf16 %v1810_v1, %v1810_v1 }
 0x515   :  { %665 = vmatmul.mubr.bf16.vlgmr.msra.gmra.mxu0 %v631_v7  ;;  %1180 = vmatmul.mubr.bf16.vlgmr.msra.gmra.mxu1 %v631_v7 }
 0x516   :  { %740 = vmatpush1.bf16.msra.mxu0 %v1353_v9  ;;  %1184 = vmatpush3.bf16.msra.mxu1 %v1412_v29 }
 0x517   :  { %741 = vmatprep.subr.bf16.mxu0 %v1355_v10  ;;  %1185 = vmatprep.subr.bf16.mxu1 %v1306_v3 }
 0x518   :  { %771 = vmatprep.mubr.bf16.mxu0 %v1307_v4  ;;  %1199 = vmatprep.mubr.msk.bf16.mxu1 %vm1308_vm0, %v1306_v3 }
 0x51a   :  { %742 = vmatpush1.bf16.msra.mxu0 %v1371_v15  ;;  %1186 = vmatpush3.bf16.msra.mxu1 %v1427_v34 }
 0x51b   :  { %743 = vmatprep.subr.bf16.mxu0 %v1374_v16  ;;  %1187 = vmatprep.subr.bf16.mxu1 %v1306_v3 }
 0x51e   :  { %744 = vmatpush1.bf16.msra.mxu0 %v1389_v21  ;;  %1188 = vmatpush3.bf16.msra.mxu1 %v1455_v43 }
 0x51f   :  { %745 = vmatprep.subr.bf16.mxu0 %v1395_v23  ;;  %1189 = vmatprep.subr.bf16.mxu1 %v1306_v3 }
 0x522   :  { %746 = vmatpush1.bf16.msra.mxu0 %v1421_v32  ;;  %1190 = vmatpush3.bf16.msra.mxu1 %v1483_v52 }
 0x523   :  { %747 = vmatprep.subr.bf16.mxu0 %v1430_v35  ;;  %1191 = vmatprep.subr.bf16.mxu1 %v1306_v3 }
 0x526   :  { %748 = vmatpush1.bf16.msra.mxu0 %v1449_v41  ;;  %1192 = vmatpush3.bf16.msra.mxu1 %v1511_v61 }
 0x527   :  { %749 = vmatprep.subr.bf16.mxu0 %v1458_v44  ;;  %1193 = vmatprep.subr.bf16.mxu1 %v1306_v3 }
 0x52a   :  { %750 = vmatpush1.bf16.msra.mxu0 %v1477_v50  ;;  %1194 = vmatpush3.bf16.msra.mxu1 %v1530_v6 }
 0x52b   :  { %751 = vmatprep.subr.bf16.mxu0 %v1486_v53  ;;  %1195 = vmatprep.subr.bf16.mxu1 %v1306_v3 }
 0x52e   :  { %752 = vmatpush1.bf16.msra.mxu0 %v1505_v59  ;;  %1196 = vmatpush3.bf16.msra.mxu1 %v1542_v11 }
 0x52f   :  { %753 = vmatprep.subr.bf16.mxu0 %v1514_v62  ;;  %1197 = vmatprep.subr.bf16.mxu1 %v1306_v3 }
 0x532   :  { %754 = vmatpush1.bf16.msra.mxu0 %v1527_v2  ;;  %1198 = vmatpush3.bf16.msra.mxu1 %v1554_v14 }
 0x533   :  { %846 = vmatprep.subr.bf16.mxu0 %v1340_v5  ;;  %1203 = vmatprep.subr.bf16.mxu1 %v1306_v3  ;;  %v977_v5 = vld [vmem:[%s1922_s0 + $0x80] sm:$0xff] }
 0x5d5   :  { %v666_v12 = vpop.f32.mrf.mxu0  ;;  %v707_v13 = vpop.f32.mrf.mxu1 }
 0x5d6   :  { %v713_v17 = vadd.f32 %v976_v8, %v666_v12  ;;  %v727_v36 = vadd.f32 %v1604_v39, %v707_v13 }
 0x5d7   :  { %v668_v18 = vpop.f32.mrf.mxu0  ;;  %v1181_v19 = vpop.f32.mrf.mxu1 }
 0x5d8   :  { %v979_v20 = vmul.f32 -1.442695, %v713_v17  ;;  %v720_v27 = vadd.f32 %v977_v5, %v668_v18 }
 0x5d9   :  { %v670_v22 = vpop.f32.mrf.mxu0  ;;  %v710_v24 = vpop.f32.mrf.mxu1 }
 0x5da   :  { %1276 = vpow2.f32 %v979_v20  ;;  %v980_v28 = vmul.f32 -1.442695, %v720_v27  ;;  %v987_v20 = vld [vmem:[%s1922_s0 + $0xb0] sm:$0xff] }
 0x5db   :  { %v671_v25 = vpop.f32.mrf.mxu0  ;;  %v1182_v26 = vpop.f32.mrf.mxu1 }
 0x5dc   :  { %1278 = vpow2.f32 %v980_v28 }
 0x5e7   :  { %v1277_v30 = vpop.eup %1276 }
 0x5e8   :  { %v717_v31 = vadd.f32 1.0, %v1277_v30  ;;  %v988_v30 = vld [vmem:[%s1922_s0 + $0xb8] sm:$0xff] }
 0x5e9   :  { %v1279_v33 = vpop.eup %1278 }
 0x5ea   :  { %1280 = vrcp.f32 %v717_v31  ;;  %v724_v45 = vadd.f32 1.0, %v1279_v33 }
 0x5f7   :  { %v1281_v37 = vpop.eup %1280 }
 0x5f8   :  { %v728_v40 = vmul.f32 %v1281_v37, %v727_v36 }
 0x5fa   :  { %v729_v42 = vadd.f32 %v978_v38, %v728_v40 }
 0x5fc   :  { %1282 = vtanh.f32 %v729_v42 }
 0x5fd   :  { %1284 = vrcp.f32 %v724_v45 }
 0x609   :  { %v1283_v46 = vpop.eup %1282 }
 0x60a   :  { %v731_v47 = vsub.f32 %v1810_v1, %v1283_v46  ;;  %v1285_v48 = vpop.eup %1284 }
 0x60c   :  { %v732_v49 = vmul.f32 %v1285_v48, %v731_v47 }
 0x60e   :  { %v1860_v51 = vadd.f32 %v1283_v46, %v732_v49 }
 0x610   :  { %v738_v54 = vpack.c.bf16 %v1860_v51, %v1860_v51 }
 0x612   :  { %772 = vmatmul.mubr.bf16.vlgmr.msra.gmra.mxu0 %v738_v54  ;;  %1200 = vmatmul.mubr.bf16.vlgmr.msra.gmra.mxu1 %v738_v54 }
 0x613   :  { %847 = vmatpush1.bf16.msra.mxu0 %v1353_v9  ;;  %1204 = vmatpush3.bf16.msra.mxu1 %v1412_v29 }
 0x614   :  { %848 = vmatprep.subr.bf16.mxu0 %v1355_v10  ;;  %1205 = vmatprep.subr.bf16.mxu1 %v1306_v3 }
 0x615   :  { %878 = vmatprep.mubr.bf16.mxu0 %v1307_v4  ;;  %1219 = vmatprep.mubr.msk.bf16.mxu1 %vm1308_vm0, %v1306_v3  ;;  %v981_v4 = vld [vmem:[%s1922_s0 + $0x90] sm:$0xff] }
 0x617   :  { %849 = vmatpush1.bf16.msra.mxu0 %v1371_v15  ;;  %1206 = vmatpush3.bf16.msra.mxu1 %v1427_v34 }
 0x618   :  { %850 = vmatprep.subr.bf16.mxu0 %v1374_v16  ;;  %1207 = vmatprep.subr.bf16.mxu1 %v1306_v3 }
 0x61b   :  { %851 = vmatpush1.bf16.msra.mxu0 %v1389_v21  ;;  %1208 = vmatpush3.bf16.msra.mxu1 %v1455_v43 }
 0x61c   :  { %852 = vmatprep.subr.bf16.mxu0 %v1395_v23  ;;  %1209 = vmatprep.subr.bf16.mxu1 %v1306_v3 }
 0x61f   :  { %853 = vmatpush1.bf16.msra.mxu0 %v1421_v32  ;;  %1210 = vmatpush3.bf16.msra.mxu1 %v1483_v52 }
 0x620   :  { %854 = vmatprep.subr.bf16.mxu0 %v1430_v35  ;;  %1211 = vmatprep.subr.bf16.mxu1 %v1306_v3 }
 0x623   :  { %855 = vmatpush1.bf16.msra.mxu0 %v1449_v41  ;;  %1212 = vmatpush3.bf16.msra.mxu1 %v1511_v61  ;;  %v983_v61 = vld [vmem:[%s1922_s0 + $0xa0] sm:$0xff] }
 0x624   :  { %856 = vmatprep.subr.bf16.mxu0 %v1458_v44  ;;  %1213 = vmatprep.subr.bf16.mxu1 %v1306_v3 }
 0x627   :  { %857 = vmatpush1.bf16.msra.mxu0 %v1477_v50  ;;  %1214 = vmatpush3.bf16.msra.mxu1 %v1530_v6 }
 0x628   :  { %858 = vmatprep.subr.bf16.mxu0 %v1486_v53  ;;  %1215 = vmatprep.subr.bf16.mxu1 %v1306_v3 }
 0x62b   :  { %859 = vmatpush1.bf16.msra.mxu0 %v1505_v59  ;;  %1216 = vmatpush3.bf16.msra.mxu1 %v1542_v11 }
 0x62c   :  { %860 = vmatprep.subr.bf16.mxu0 %v1514_v62  ;;  %1217 = vmatprep.subr.bf16.mxu1 %v1306_v3  ;;  %v982_v3 = vld [vmem:[%s1922_s0 + $0x98] sm:$0xff] }
 0x62f   :  { %861 = vmatpush1.bf16.msra.mxu0 %v1527_v2  ;;  %1218 = vmatpush3.bf16.msra.mxu1 %v1554_v14 }
 0x6d2   :  { %v773_v9 = vpop.f32.mrf.mxu0  ;;  %v814_v10 = vpop.f32.mrf.mxu1 }
 0x6d3   :  { %v820_v15 = vadd.f32 %v981_v4, %v773_v9  ;;  %v834_v53 = vadd.f32 %v1604_v39, %v814_v10 }
 0x6d4   :  { %v775_v16 = vpop.f32.mrf.mxu0  ;;  %v1201_v21 = vpop.f32.mrf.mxu1 }
 0x6d5   :  { %v984_v23 = vmul.f32 -1.442695, %v820_v15  ;;  %v827_v41 = vadd.f32 %v982_v3, %v775_v16 }
 0x6d6   :  { %v777_v29 = vpop.f32.mrf.mxu0  ;;  %v817_v32 = vpop.f32.mrf.mxu1 }
 0x6d7   :  { %1286 = vpow2.f32 %v984_v23  ;;  %v985_v43 = vmul.f32 -1.442695, %v827_v41 }
 0x6d8   :  { %v778_v34 = vpop.f32.mrf.mxu0  ;;  %v1202_v35 = vpop.f32.mrf.mxu1 }
 0x6d9   :  { %1288 = vpow2.f32 %v985_v43 }
 0x6e4   :  { %v1287_v44 = vpop.eup %1286 }
 0x6e5   :  { %v824_v50 = vadd.f32 1.0, %v1287_v44 }
 0x6e6   :  { %v1289_v52 = vpop.eup %1288 }
 0x6e7   :  { %1290 = vrcp.f32 %v824_v50  ;;  %v831_v6 = vadd.f32 1.0, %v1289_v52 }
 0x6f4   :  { %v1291_v59 = vpop.eup %1290 }
 0x6f5   :  { %v835_v62 = vmul.f32 %v1291_v59, %v834_v53 }
 0x6f7   :  { %v836_v2 = vadd.f32 %v983_v61, %v835_v62 }
 0x6f9   :  { %1292 = vtanh.f32 %v836_v2 }
 0x6fa   :  { %1294 = vrcp.f32 %v831_v6 }
 0x706   :  { %v1293_v11 = vpop.eup %1292 }
 0x707   :  { %v838_v14 = vsub.f32 %v1860_v51, %v1293_v11  ;;  %v1295_v55 = vpop.eup %1294 }
 0x709   :  { %v839_v56 = vmul.f32 %v1295_v55, %v838_v14 }
 0x70b   :  { %v840_v57 = vadd.f32 %v1293_v11, %v839_v56 }
 0x70d   :  { %v845_v58 = vpack.c.bf16 %v840_v57, %v840_v57 }
 0x70f   :  { %879 = vmatmul.mubr.bf16.vlgmr.msra.gmra.mxu0 %v845_v58  ;;  %1220 = vmatmul.mubr.bf16.vlgmr.msra.gmra.mxu1 %v845_v58 }
 0x7cf   :  { %v880_v63 = vpop.f32.mrf.mxu0  ;;  %v921_v0 = vpop.f32.mrf.mxu1 }
 0x7d0   :  { %v927_v1 = vadd.f32 %v986_v60, %v880_v63  ;;  %v941_v27 = vadd.f32 %v1604_v39, %v921_v0 }
 0x7d1   :  { %v882_v7 = vpop.f32.mrf.mxu0  ;;  %v1221_v8 = vpop.f32.mrf.mxu1 }
 0x7d2   :  { %v989_v12 = vmul.f32 -1.442695, %v927_v1  ;;  %v934_v22 = vadd.f32 %v987_v20, %v882_v7 }
 0x7d3   :  { %v884_v13 = vpop.f32.mrf.mxu0  ;;  %v924_v17 = vpop.f32.mrf.mxu1 }
 0x7d4   :  { %1296 = vpow2.f32 %v989_v12  ;;  %v990_v24 = vmul.f32 -1.442695, %v934_v22 }
 0x7d5   :  { %v885_v18 = vpop.f32.mrf.mxu0  ;;  %v1222_v19 = vpop.f32.mrf.mxu1 }
 0x7d6   :  { %1298 = vpow2.f32 %v990_v24 }
 0x7e1   :  { %v1297_v25 = vpop.eup %1296 }
 0x7e2   :  { %v931_v26 = vadd.f32 1.0, %v1297_v25 }
 0x7e3   :  { %v1299_v5 = vpop.eup %1298 }
 0x7e4   :  { %1300 = vrcp.f32 %v931_v26  ;;  %v938_v36 = vadd.f32 1.0, %v1299_v5 }
 0x7f1   :  { %v1301_v28 = vpop.eup %1300 }
 0x7f2   :  { %v942_v31 = vmul.f32 %v1301_v28, %v941_v27 }
 0x7f4   :  { %v943_v33 = vadd.f32 %v988_v30, %v942_v31 }
 0x7f6   :  { %1302 = vtanh.f32 %v943_v33 }
 0x7f7   :  { %1304 = vrcp.f32 %v938_v36 }
 0x803   :  { %v1303_v37 = vpop.eup %1302 }
 0x804   :  { %v945_v38 = vsub.f32 %v840_v57, %v1303_v37  ;;  %v1305_v40 = vpop.eup %1304 }
 0x806   :  { %v946_v42 = vmul.f32 %v1305_v40, %v945_v38 }
 0x808   :  { %v947_v45 = vadd.f32 %v1303_v37, %v946_v42 }
 0x80a   :  { %948 = vst [vmem:[%s1924_s3] sm:$0xff] %v947_v45 }

</bundles_post_ra>
